<compile_context>
chip_gen: v7x
topology: tpu7x:2x2x1
jax: 0.10.0
libtpu: 0.0.40
codegen_flags: <defaults>
</compile_context>

<pallas_src>
import functools

import jax
import jax.numpy as jnp
from jax.experimental import pallas as pl
from jax.experimental.pallas import tpu as pltpu


def mlp_kernel(x_ref, w1_ref, b1_ref, w2_ref, b2_ref, w3_ref, b3_ref, o_ref):
    # x_ref: (in_features, TB)  -- batch on lanes
    x = x_ref[...]

    # Layer 1: Linear(18 -> 20) + ReLU
    h1 = jnp.dot(w1_ref[...], x, preferred_element_type=jnp.float32) + b1_ref[...]
    h1 = jnp.maximum(h1, 0.0)

    # Layer 2: Linear(20 -> 20) + ReLU
    h2 = jnp.dot(w2_ref[...], h1, preferred_element_type=jnp.float32) + b2_ref[...]
    h2 = jnp.maximum(h2, 0.0)

    # Output layer: Linear(20 -> 2), no activation
    out = jnp.dot(w3_ref[...], h2, preferred_element_type=jnp.float32) + b3_ref[...]
    o_ref[...] = out.astype(o_ref.dtype)


def _round_up(x, m):
    return ((x + m - 1) // m) * m


@functools.partial(jax.jit, static_argnames=())
def ann_model_forward(x, params):
    """x: (batch, 18) float32.  params: PyTorch-layout weights/biases.

    Returns (batch, 2) float32, matching ANN_Model.forward.
    """
    w1, b1 = params["w1"], params["b1"]   # (20, 18), (20, 1)
    w2, b2 = params["w2"], params["b2"]   # (20, 20), (20, 1)
    w3, b3 = params["w3"], params["b3"]   # (2, 20),  (2, 1)

    batch, in_features = x.shape
    out_features = w3.shape[0]

    # Batch tile: multiple of 128 (lane width); large enough to amortize
    # per-grid-step overhead, small enough to be trivially VMEM-safe.
    TB = min(1024, _round_up(batch, 128))
    padded_batch = _round_up(batch, TB)
    grid = (padded_batch // TB,)

    # Transpose once so batch maps to lanes; zero-pad batch to a TB multiple.
    x_t = jnp.pad(x.T, ((0, 0), (0, padded_batch - batch)))   # (18, padded_batch)

    const_map = lambda i: (0, 0)

    flops = 2 * padded_batch * (
        in_features * w1.shape[0] + w1.shape[0] * w2.shape[0] + w2.shape[0] * out_features
    )
    bytes_accessed = 4 * (
        x_t.size + w1.size + b1.size + w2.size + b2.size + w3.size + b3.size
        + out_features * padded_batch
    )

    out_t = pl.pallas_call(
        mlp_kernel,
        out_shape=jax.ShapeDtypeStruct((out_features, padded_batch), jnp.float32),
        grid=grid,
        in_specs=[
            pl.BlockSpec((in_features, TB), lambda i: (0, i)),   # activations: tiled over batch
            pl.BlockSpec(w1.shape, const_map),                   # weights/biases: resident
            pl.BlockSpec(b1.shape, const_map),
            pl.BlockSpec(w2.shape, const_map),
            pl.BlockSpec(b2.shape, const_map),
            pl.BlockSpec(w3.shape, const_map),
            pl.BlockSpec(b3.shape, const_map),
        ],
        out_specs=pl.BlockSpec((out_features, TB), lambda i: (0, i)),
        compiler_params=pltpu.CompilerParams(
            dimension_semantics=("parallel",),   # megacore sharding on v7x
        ),
        cost_estimate=pl.CostEstimate(
            flops=flops, transcendentals=0, bytes_accessed=bytes_accessed
        ),
    )(x_t, w1, b1, w2, b2, w3, b3)

    # Drop batch padding, return (batch, out_features) like the PyTorch module.
    return out_t[:, :batch].T


def init_params(key, input_features=18, hidden1=20, hidden2=20, out_features=2):
    """Deterministic synthetic init (mimics PyTorch Linear's uniform fan-in init).

    Weights stored PyTorch-native (out_features, in_features); biases (out, 1)
    so they broadcast across the lane (batch) axis inside the kernel.
    """
    ks = jax.random.split(key, 6)

    def linear_init(kw, kb, fan_in, fan_out):
        bound = 1.0 / jnp.sqrt(fan_in)
        w = jax.random.uniform(kw, (fan_out, fan_in), jnp.float32, -bound, bound)
        b = jax.random.uniform(kb, (fan_out, 1), jnp.float32, -bound, bound)
        return w, b

    w1, b1 = linear_init(ks[0], ks[1], input_features, hidden1)
    w2, b2 = linear_init(ks[2], ks[3], hidden1, hidden2)
    w3, b3 = linear_init(ks[4], ks[5], hidden2, out_features)
    return dict(w1=w1, b1=b1, w2=w2, b2=b2, w3=w3, b3=b3)


def ann_model_reference(x, params):
    """Pure-JAX reference (PyTorch semantics: x @ W.T + b)."""
    h1 = jnp.maximum(x @ params["w1"].T + params["b1"].T, 0.0)
    h2 = jnp.maximum(h1 @ params["w2"].T + params["b2"].T, 0.0)
    return h2 @ params["w3"].T + params["b3"].T


if __name__ == "__main__":
    key = jax.random.PRNGKey(0)
    k_x, k_p = jax.random.split(key)

    batch, input_features = 8, 18
    x = jax.random.normal(k_x, (batch, input_features), jnp.float32)
    params = init_params(k_p, input_features=input_features)

    out = ann_model_forward(x, params)
    out = jax.block_until_ready(out)

    ref = ann_model_reference(x, params)
    assert out.shape == (batch, 2), out.shape
    assert jnp.allclose(out, ref, atol=1e-5, rtol=1e-5), "mismatch vs reference"

    print("KERNEL_OK")
</pallas_src>

<mosaic_0001>
module attributes {stable_mosaic.version = 11 : i64} {
  func.func @mlp_kernel(%arg0: i32, %arg1: memref<18x128xf32, #tpu.memory_space<vmem>>, %arg2: memref<20x18xf32, #tpu.memory_space<vmem>>, %arg3: memref<20x1xf32, #tpu.memory_space<vmem>>, %arg4: memref<20x20xf32, #tpu.memory_space<vmem>>, %arg5: memref<20x1xf32, #tpu.memory_space<vmem>>, %arg6: memref<2x20xf32, #tpu.memory_space<vmem>>, %arg7: memref<2x1xf32, #tpu.memory_space<vmem>>, %arg8: memref<2x128xf32, #tpu.memory_space<vmem>>) attributes {dimension_semantics = [#tpu.dimension_semantics<parallel>], iteration_bounds = array<i64: 1>, scalar_prefetch = 0 : i64, scratch_operands = 0 : i64, tpu.core_type = #tpu.core_type<tc>, window_params = [{transform_indices = @transform_0, window_bounds = array<i64: 18, 128>}, {pipeline_mode = #tpu.pipeline_mode<synchronous>, transform_indices = @transform_1, window_bounds = array<i64: 20, 18>}, {pipeline_mode = #tpu.pipeline_mode<synchronous>, transform_indices = @transform_2, window_bounds = array<i64: 20, 1>}, {pipeline_mode = #tpu.pipeline_mode<synchronous>, transform_indices = @transform_3, window_bounds = array<i64: 20, 20>}, {pipeline_mode = #tpu.pipeline_mode<synchronous>, transform_indices = @transform_4, window_bounds = array<i64: 20, 1>}, {pipeline_mode = #tpu.pipeline_mode<synchronous>, transform_indices = @transform_5, window_bounds = array<i64: 2, 20>}, {pipeline_mode = #tpu.pipeline_mode<synchronous>, transform_indices = @transform_6, window_bounds = array<i64: 2, 1>}, {transform_indices = @transform_7, window_bounds = array<i64: 2, 128>}]} {
    %c0 = arith.constant 0 : index
    %c0_0 = arith.constant 0 : index
    %0 = vector.load %arg1[%c0, %c0_0] : memref<18x128xf32, #tpu.memory_space<vmem>>, vector<18x128xf32>
    %c0_1 = arith.constant 0 : index
    %c0_2 = arith.constant 0 : index
    %1 = vector.load %arg2[%c0_1, %c0_2] : memref<20x18xf32, #tpu.memory_space<vmem>>, vector<20x18xf32>
    %cst = arith.constant dense<0.000000e+00> : vector<20x128xf32>
    %2 = tpu.matmul %1, %0, %cst {dimension_numbers = #tpu.dot_dimension_numbers<[1], [0], [0], [1], [0, 0, 1, 1], [], []>} : vector<20x18xf32>, vector<18x128xf32>, vector<20x128xf32> -> vector<20x128xf32>
    %c0_3 = arith.constant 0 : index
    %c0_4 = arith.constant 0 : index
    %3 = vector.load %arg3[%c0_3, %c0_4] : memref<20x1xf32, #tpu.memory_space<vmem>>, vector<20x1xf32>
    %4 = vector.broadcast %3 : vector<20x1xf32> to vector<20x128xf32>
    %5 = arith.addf %2, %4 : vector<20x128xf32>
    %cst_5 = arith.constant 0.000000e+00 : f32
    %6 = vector.broadcast %cst_5 : f32 to vector<20x128xf32>
    %7 = arith.maximumf %5, %6 : vector<20x128xf32>
    %c0_6 = arith.constant 0 : index
    %c0_7 = arith.constant 0 : index
    %8 = vector.load %arg4[%c0_6, %c0_7] : memref<20x20xf32, #tpu.memory_space<vmem>>, vector<20x20xf32>
    %cst_8 = arith.constant dense<0.000000e+00> : vector<20x128xf32>
    %9 = tpu.matmul %8, %7, %cst_8 {dimension_numbers = #tpu.dot_dimension_numbers<[1], [0], [0], [1], [0, 0, 1, 1], [], []>} : vector<20x20xf32>, vector<20x128xf32>, vector<20x128xf32> -> vector<20x128xf32>
    %c0_9 = arith.constant 0 : index
    %c0_10 = arith.constant 0 : index
    %10 = vector.load %arg5[%c0_9, %c0_10] : memref<20x1xf32, #tpu.memory_space<vmem>>, vector<20x1xf32>
    %11 = vector.broadcast %10 : vector<20x1xf32> to vector<20x128xf32>
    %12 = arith.addf %9, %11 : vector<20x128xf32>
    %cst_11 = arith.constant 0.000000e+00 : f32
    %13 = vector.broadcast %cst_11 : f32 to vector<20x128xf32>
    %14 = arith.maximumf %12, %13 : vector<20x128xf32>
    %c0_12 = arith.constant 0 : index
    %c0_13 = arith.constant 0 : index
    %15 = vector.load %arg6[%c0_12, %c0_13] : memref<2x20xf32, #tpu.memory_space<vmem>>, vector<2x20xf32>
    %cst_14 = arith.constant dense<0.000000e+00> : vector<2x128xf32>
    %16 = tpu.matmul %15, %14, %cst_14 {dimension_numbers = #tpu.dot_dimension_numbers<[1], [0], [0], [1], [0, 0, 1, 1], [], []>} : vector<2x20xf32>, vector<20x128xf32>, vector<2x128xf32> -> vector<2x128xf32>
    %c0_15 = arith.constant 0 : index
    %c0_16 = arith.constant 0 : index
    %17 = vector.load %arg7[%c0_15, %c0_16] : memref<2x1xf32, #tpu.memory_space<vmem>>, vector<2x1xf32>
    %18 = vector.broadcast %17 : vector<2x1xf32> to vector<2x128xf32>
    %19 = arith.addf %16, %18 : vector<2x128xf32>
    %c0_17 = arith.constant 0 : index
    %c0_18 = arith.constant 0 : index
    %20 = vector.load %arg8[%c0_17, %c0_18] : memref<2x128xf32, #tpu.memory_space<vmem>>, vector<2x128xf32>
    tpu.vector_store %arg8[%c0_17, %c0_18], %19 {strides = array<i32>} : memref<2x128xf32, #tpu.memory_space<vmem>>, vector<2x128xf32>,
    return
  }
  func.func @transform_0(%arg0: i32) -> (i32, i32) {
    %c0_i32 = arith.constant 0 : i32
    %c0_i32_0 = arith.constant 0 : i32
    return %c0_i32, %arg0 : i32, i32
  }
  func.func @transform_1(%arg0: i32) -> (i32, i32) {
    %c0_i32 = arith.constant 0 : i32
    %c0_i32_0 = arith.constant 0 : i32
    %c0_i32_1 = arith.constant 0 : i32
    return %c0_i32, %c0_i32_0 : i32, i32
  }
  func.func @transform_2(%arg0: i32) -> (i32, i32) {
    %c0_i32 = arith.constant 0 : i32
    %c0_i32_0 = arith.constant 0 : i32
    %c0_i32_1 = arith.constant 0 : i32
    return %c0_i32, %c0_i32_0 : i32, i32
  }
  func.func @transform_3(%arg0: i32) -> (i32, i32) {
    %c0_i32 = arith.constant 0 : i32
    %c0_i32_0 = arith.constant 0 : i32
    %c0_i32_1 = arith.constant 0 : i32
    return %c0_i32, %c0_i32_0 : i32, i32
  }
  func.func @transform_4(%arg0: i32) -> (i32, i32) {
    %c0_i32 = arith.constant 0 : i32
    %c0_i32_0 = arith.constant 0 : i32
    %c0_i32_1 = arith.constant 0 : i32
    return %c0_i32, %c0_i32_0 : i32, i32
  }
  func.func @transform_5(%arg0: i32) -> (i32, i32) {
    %c0_i32 = arith.constant 0 : i32
    %c0_i32_0 = arith.constant 0 : i32
    %c0_i32_1 = arith.constant 0 : i32
    return %c0_i32, %c0_i32_0 : i32, i32
  }
  func.func @transform_6(%arg0: i32) -> (i32, i32) {
    %c0_i32 = arith.constant 0 : i32
    %c0_i32_0 = arith.constant 0 : i32
    %c0_i32_1 = arith.constant 0 : i32
    return %c0_i32, %c0_i32_0 : i32, i32
  }
  func.func @transform_7(%arg0: i32) -> (i32, i32) {
    %c0_i32 = arith.constant 0 : i32
    %c0_i32_0 = arith.constant 0 : i32
    return %c0_i32, %arg0 : i32, i32
  }
}

</mosaic_0001>

<bundles_post_ra>
// kernel: ann_model_forward.1
= control target key start
LH: loop header
LB: loop body
LE: loop exit
PB: predicated region body
PF: predicated region fallthrough
CT: control target
= control target key end

     0   :  { %v433_v0 = vmov 0.0|0.0   ;;  %vm434_vm0 = vmmov 0   ;;  %v435_v3 = vmov 0.0   ;;  %v436_v5 = vmov 0   ;;  %s557_s0 = inlined_call_operand.vmem [shape: f32[18,128], index: 0, kind: input, shape index: {}]   ;;  %s558_s2 = inlined_call_operand.vmem [shape: f32[20,1], index: 2, kind: input, shape index: {}]   ;;  %s559_s1 = inlined_call_operand.vmem [shape: f32[20,18], index: 1, kind: input, shape index: {}]   ;;  %s560_s4 = inlined_call_operand.vmem [shape: f32[20,1], index: 4, kind: input, shape index: {}]   ;;  %s561_s6 = inlined_call_operand.vmem [shape: f32[2,1], index: 6, kind: input, shape index: {}]   ;;  %s562_s3 = inlined_call_operand.vmem [shape: f32[20,20], index: 3, kind: input, shape index: {}]   ;;  %s563_s5 = inlined_call_operand.vmem [shape: f32[2,20], index: 5, kind: input, shape index: {}]   ;;  %s564_s7 = inlined_call_operand.vmem [shape: f32[2,128], index: 7, kind: output, shape index: {}]  }
   0x1   :  { %418 = vmatprep.subr.bf16.mxu0 %v433_v0  ;;  %v26_v1 = vld [vmem:[%s557_s0] sm:$0xff]  ;;  %v27_v2 = vld [vmem:[%s557_s0 + $0x8] sm:$0xff]  ;;  %385 = vmatprep.mubr.msk.f32.mxu0 %vm434_vm0, %v435_v3  ;;  %v34_v7 = vld [vmem:[%s558_s2 + $0x10] sm:$0xf]  ;;  %vm60_vm1 = vcmask 1041408   ;;  %vm50_vm2 = vcmask 146432  }
   0x2   :  { %v419_v4 = vpack.c.bf16 %v27_v2, %v26_v1  ;;  %431 = vset.pattern.permute.xlu0 %v436_v5  ;;  %432 = vset.pattern.permute.xlu1 %v436_v5  ;;  %v32_v6 = vld [vmem:[%s558_s2] sm:$0xff]  ;;  %v28_v8 = vld [vmem:[%s557_s0 + $0x10] sm:$0x3]  ;;  %v33_v9 = vld [vmem:[%s558_s2 + $0x8] sm:$0xff]  ;;  %vm178_vm3 = vcmask 1043456   ;;  %vm168_vm4 = vcmask 162816  }
   0x3   :  { %421 = vmatprep.subr.bf16.mxu1 %v433_v0  ;;  %400 = vmatprep.mubr.msk.f32.mxu1 %vm434_vm0, %v435_v3  ;;  %v29_v10 = vld [vmem:[%s559_s1] sm:$0xff]  ;;  %v151_v12 = vld [vmem:[%s560_s4 + $0x8] sm:$0xff]  ;;  %v152_v14 = vld [vmem:[%s560_s4 + $0x10] sm:$0xf] }
   0x4   :  { %420 = vmatpush3.bf16.msra.mxu0 %v419_v4  ;;  %37 = vperm.xlu0 %431, %v32_v6   ;;  %v150_v11 = vld [vmem:[%s560_s4] sm:$0xff]  ;;  %v30_v13 = vld [vmem:[%s559_s1 + $0x8] sm:$0xff]  ;;  %v31_v16 = vld [vmem:[%s559_s1 + $0x10] sm:$0xf] }
   0x5   :  { %383 = vmatprep.subr.mxu0 %v435_v3  ;;  %47 = vperm.xlu1 %432, %v34_v7   ;;  %v266_v15 = vld [vmem:[%s561_s6] sm:$0x3]  ;;  %v148_v34 = vld [vmem:[%s562_s3 + $0x8] sm:$0xff]  ;;  %v149_v35 = vld [vmem:[%s562_s3 + $0x10] sm:$0xf] }
   0x6   :  { %v147_v33 = vld [vmem:[%s562_s3] sm:$0xff] }
   0x7   :  { %v265_v52 = vld [vmem:[%s563_s5] sm:$0x3] }
   0x8   :  { %384 = vmatpush3.msk.msra.mxu0 %vm60_vm1, %v28_v8  ;;  %42 = vperm.xlu0 %431, %v33_v9  }
   0x9   :  { %386 = vmatmul.mubr.msk.f32.vlgmr.msra.gmra.mrb[0].mxu0 %vm50_vm2, %v29_v10  ;;  %155 = vperm.xlu1 %432, %v150_v11  }
   0xa   :  { %388 = vmatprep.mubr.msk.f32.mxu0 %vm434_vm0, %v435_v3  ;;  %424 = vmatprep.subr.bf16.mxu0 %v433_v0 }
   0xc   :  { %160 = vperm.xlu0 %431, %v151_v12  }
   0xd   :  { %389 = vmatmul.mubr.msk.f32.gmra.mrb[2].mxu0 %vm50_vm2, %v30_v13  ;;  %165 = vperm.xlu1 %432, %v152_v14  }
   0xe   :  { %391 = vmatprep.mubr.msk.f32.mxu0 %vm434_vm0, %v435_v3 }
  0x10   :  { %269 = vperm.xlu0 %431, %v266_v15  }
  0x11   :  { %392 = vmatmul.mubr.msk.f32.gmra.mrb[4].mxu0 %vm50_vm2, %v31_v16 }
  0x12   :  { %415 = vmatprep.mubr.msk.f32.mxu0 %vm434_vm0, %v435_v3 }
  0x83   :  { %v38_v17 = vpop.permute.xlu0 %37 }
  0x84   :  { %v48_v27 = vpop.permute.xlu1 %47 }
  0x87   :  { %v43_v21 = vpop.permute.xlu0 %42 }
  0x88   :  { %v156_v38 = vpop.permute.xlu1 %155 }
  0x8b   :  { %v161_v40 = vpop.permute.xlu0 %160 }
  0x8c   :  { %v166_v46 = vpop.permute.xlu1 %165 }
  0x8f   :  { %v270_v53 = vpop.permute.xlu0 %269 }
  0xdc   :  { %v130_v18 = vpop.f32.mrb[0].mxu0 }
  0xdd   :  { %v387_v19 = vpop.f32.mrb[1].mxu0  ;;  %v131_v20 = vadd.f32 %v130_v18, %v38_v17 }
  0xdf   :  { %v144_v25 = vmax.f32 %v131_v20, 0.0 }
  0xe0   :  { %v135_v22 = vpop.f32.mrb[2].mxu0 }
  0xe1   :  { %v136_v23 = vadd.f32 %v135_v22, %v43_v21  ;;  %v390_v24 = vpop.f32.mrb[3].mxu0 }
  0xe3   :  { %v145_v26 = vmax.f32 %v136_v23, 0.0 }
  0xe4   :  { %v140_v28 = vpop.f32.mrb[4].mxu0 }
  0xe5   :  { %v141_v29 = vadd.f32 %v140_v28, %v48_v27  ;;  %v393_v30 = vpop.f32.mrb[5].mxu0  ;;  %v422_v31 = vpack.c.bf16 %v145_v26, %v144_v25 }
  0xe7   :  { %v146_v32 = vmax.f32 %v141_v29, 0.0  ;;  %423 = vmatpush3.bf16.msra.mxu1 %v422_v31 }
  0xe8   :  { %398 = vmatprep.subr.mxu1 %v435_v3 }
  0xeb   :  { %399 = vmatpush3.msk.msra.mxu1 %vm178_vm3, %v146_v32 }
  0xec   :  { %401 = vmatmul.mubr.msk.f32.vlgmr.msra.gmra.mrb[0].mxu1 %vm168_vm4, %v147_v33 }
  0xed   :  { %403 = vmatprep.mubr.msk.f32.mxu1 %vm434_vm0, %v435_v3 }
  0xf0   :  { %404 = vmatmul.mubr.msk.f32.gmra.mrb[2].mxu1 %vm168_vm4, %v148_v34 }
  0xf1   :  { %406 = vmatprep.mubr.msk.f32.mxu1 %vm434_vm0, %v435_v3 }
  0xf4   :  { %407 = vmatmul.mubr.msk.f32.gmra.mrb[4].mxu1 %vm168_vm4, %v149_v35 }
 0x1bf   :  { %v248_v36 = vpop.f32.mrb[0].mxu1 }
 0x1c0   :  { %v402_v37 = vpop.f32.mrb[1].mxu1  ;;  %v249_v39 = vadd.f32 %v248_v36, %v156_v38 }
 0x1c2   :  { %v262_v44 = vmax.f32 %v249_v39, 0.0 }
 0x1c3   :  { %v253_v41 = vpop.f32.mrb[2].mxu1 }
 0x1c4   :  { %v254_v42 = vadd.f32 %v253_v41, %v161_v40  ;;  %v405_v43 = vpop.f32.mrb[3].mxu1 }
 0x1c6   :  { %v263_v45 = vmax.f32 %v254_v42, 0.0 }
 0x1c7   :  { %v258_v47 = vpop.f32.mrb[4].mxu1 }
 0x1c8   :  { %v425_v48 = vpack.c.bf16 %v263_v45, %v262_v44  ;;  %v259_v49 = vadd.f32 %v258_v47, %v166_v46  ;;  %v408_v50 = vpop.f32.mrb[5].mxu1 }
 0x1ca   :  { %426 = vmatpush3.bf16.msra.mxu0 %v425_v48  ;;  %v264_v51 = vmax.f32 %v259_v49, 0.0 }
 0x1cb   :  { %413 = vmatprep.subr.mxu0 %v435_v3 }
 0x1ce   :  { %414 = vmatpush3.msk.msra.mxu0 %vm178_vm3, %v264_v51 }
 0x1cf   :  { %416 = vmatmul.mubr.msk.f32.vlgmr.msra.gmra.mrb[6].mxu0 %vm168_vm4, %v265_v52 }
 0x2a2   :  { %v344_v54 = vpop.f32.mrb[6].mxu0 }
 0x2a3   :  { %v345_v55 = vadd.f32 %v344_v54, %v270_v53  ;;  %v417_v56 = vpop.f32.mrb[7].mxu0 }
 0x2a5   :  { %348 = vst [vmem:[%s564_s7] sm:$0x3] %v345_v55 }

</bundles_post_ra>
